<compile_context>
chip_gen: v7x
topology: tpu7x:2x2x1
jax: 0.10.0
libtpu: 0.0.40
codegen_flags: <defaults>
</compile_context>

<pallas_src>
import jax
import jax.numpy as jnp
from jax.experimental import pallas as pl
from jax.experimental.pallas import tpu as pltpu


def _round_up(x, m):
    return ((x + m - 1) // m) * m


def _cdiv(a, b):
    return (a + b - 1) // b


def gated_fusion_kernel(x1_ref, x2_ref, w1_ref, w2_ref, wg1_ref, wg2_ref,
                        b2_ref, bd_ref, bgp_ref, out_ref, acc1_ref, acc2_ref):
    j = pl.program_id(1)
    tn = out_ref.shape[1]

    # Raw projections (no bias) once per batch tile, f32 accumulation into
    # VMEM scratch; reused by every fused-dim column tile j.
    @pl.when(j == 0)
    def _():
        acc1_ref[...] = jnp.dot(x1_ref[...].astype(w1_ref.dtype), w1_ref[...],
                                preferred_element_type=jnp.float32)
        acc2_ref[...] = jnp.dot(x2_ref[...].astype(w2_ref.dtype), w2_ref[...],
                                preferred_element_type=jnp.float32)

    x1m = acc1_ref[...]
    x2m = acc2_ref[...]

    # Gate for this column tile: concat([x1_, x2_]) @ Wg == x1_@Wg_top + x2_@Wg_bot.
    # Biases were folded into bgp in the wrapper, so the MXU consumes the raw
    # products (bf16 in, f32 accumulate).
    gate_pre = (jnp.dot(x1m.astype(wg1_ref.dtype), wg1_ref[...],
                        preferred_element_type=jnp.float32)
                + jnp.dot(x2m.astype(wg2_ref.dtype), wg2_ref[...],
                          preferred_element_type=jnp.float32)
                + bgp_ref[...])
    g = jax.nn.sigmoid(gate_pre)

    # Blend epilogue on this column tile:
    #   out = x2_ + g * (x1_ - x2_)  with  x1_ - x2_ = x1m - x2m + (b1 - b2)
    col = pl.multiple_of(j * tn, 128)
    x1s = acc1_ref[:, pl.ds(col, tn)]
    x2s = acc2_ref[:, pl.ds(col, tn)]
    out_ref[...] = (x2s + b2_ref[...]
                    + g * (x1s - x2s + bd_ref[...])).astype(out_ref.dtype)


def gated_fusion(x1, x2, params, *, tb=256, tn=512, out_dtype=jnp.float32,
                 mxu_dtype=jnp.bfloat16):
    """x1: [B, dim1], x2: [B, dim2] -> [B, fused_dim].

    tb: target batch-tile rows (sweep 256/512 on v5e/v6e, 128/256 on v7x).
    tn: target fused-dim column tile (multiple of 128 after balancing).
    """
    w1, b1, w2, b2, wg1, wg2, bg = params
    # Robustness: accept PyTorch-style 1-D biases.
    b1 = jnp.asarray(b1).reshape(1, -1)
    b2 = jnp.asarray(b2).reshape(1, -1)
    bg = jnp.asarray(bg).reshape(1, -1)

    B, dim1 = x1.shape
    dim2 = x2.shape[1]
    F = w1.shape[1]

    # Fold the gate-bias chain and the blend bias delta (exact, f32).
    bgp = b1 @ wg1 + b2 @ wg2 + bg      # (1, F)
    bd = b1 - b2                        # (1, F)

    # ---- fused-dim tiling: lane-dense, balanced column tiles ----
    nf = max(1, _cdiv(_round_up(F, 128), tn))
    TN = _round_up(_cdiv(F, nf), 128)
    Fp = nf * TN
    pad_f = Fp - F
    if pad_f:
        w1 = jnp.pad(w1, ((0, 0), (0, pad_f)))
        w2 = jnp.pad(w2, ((0, 0), (0, pad_f)))
        wg1 = jnp.pad(wg1, ((0, pad_f), (0, pad_f)))
        wg2 = jnp.pad(wg2, ((0, pad_f), (0, pad_f)))
        b2 = jnp.pad(b2, ((0, 0), (0, pad_f)))
        bd = jnp.pad(bd, ((0, 0), (0, pad_f)))
        bgp = jnp.pad(bgp, ((0, 0), (0, pad_f)))

    # ---- contraction dims padded to sublane multiples of 8 ----
    d1p = _round_up(dim1, 8)
    d2p = _round_up(dim2, 8)
    if d1p != dim1:
        x1 = jnp.pad(x1, ((0, 0), (0, d1p - dim1)))
        w1 = jnp.pad(w1, ((0, d1p - dim1), (0, 0)))
    if d2p != dim2:
        x2 = jnp.pad(x2, ((0, 0), (0, d2p - dim2)))
        w2 = jnp.pad(w2, ((0, d2p - dim2), (0, 0)))

    # ---- batch tiling: balanced 8-row tiles, >= 2 tiles when possible so the
    # "parallel" axis can use both TensorCores on v7x ----
    B8 = _round_up(B, 8)
    nb = max(1, _cdiv(B8, tb))
    if B8 >= 16:
        nb = max(nb, 2)
    TB = _round_up(_cdiv(B8, nb), 8)
    nb = _cdiv(B8, TB)
    Bp = nb * TB
    if Bp != B:
        x1 = jnp.pad(x1, ((0, Bp - B), (0, 0)))
        x2 = jnp.pad(x2, ((0, Bp - B), (0, 0)))

    # ---- bf16 weights to the MXU (accumulation stays f32 in-kernel) ----
    w1 = w1.astype(mxu_dtype)
    w2 = w2.astype(mxu_dtype)
    wg1 = wg1.astype(mxu_dtype)
    wg2 = wg2.astype(mxu_dtype)
    b2 = b2.astype(jnp.float32)
    bd = bd.astype(jnp.float32)
    bgp = bgp.astype(jnp.float32)

    # ---- VMEM budget (sized against v7x's 64 MiB / v5e's small scoped default) ----
    wsize = jnp.dtype(mxu_dtype).itemsize
    osize = jnp.dtype(out_dtype).itemsize
    wg_bufs = 1 if nf == 1 else 2
    vmem_need = (2 * TB * (d1p + d2p) * 4            # x tiles, double-buffered
                 + (d1p + d2p) * Fp * wsize          # W1/W2, single-buffered
                 + wg_bufs * 2 * Fp * TN * wsize     # gate-weight column tiles
                 + wg_bufs * 3 * 8 * TN * 4          # bias tiles
                 + 2 * TB * TN * osize               # output tiles
                 + 2 * TB * Fp * 4)                  # projection scratch
    vmem_limit = int(min(max(int(vmem_need * 1.25) + (2 << 20), 32 << 20),
                         56 << 20))

    cost = pl.CostEstimate(
        flops=2 * Bp * Fp * (d1p + d2p + 2 * Fp),
        transcendentals=Bp * Fp,                     # sigmoid
        bytes_accessed=(4 * Bp * (d1p + d2p)                     # activations
                        + wsize * ((d1p + d2p) * Fp + 2 * Fp * Fp)  # weights
                        + 4 * 3 * Fp                              # biases
                        + osize * Bp * Fp),                       # output
    )

    def _spec(shape, index_map, buffers=None):
        if buffers is None:
            return pl.BlockSpec(shape, index_map)
        return pl.BlockSpec(shape, index_map, pipeline_mode=pl.Buffered(buffers))

    wg_single = 1 if nf == 1 else None

    grid_spec = pltpu.PrefetchScalarGridSpec(
        num_scalar_prefetch=0,
        grid=(nb, nf),
        in_specs=[
            _spec((TB, d1p), lambda i, j: (i, 0)),                 # x1
            _spec((TB, d2p), lambda i, j: (i, 0)),                 # x2
            _spec((d1p, Fp), lambda i, j: (0, 0), buffers=1),      # W1 (resident)
            _spec((d2p, Fp), lambda i, j: (0, 0), buffers=1),      # W2 (resident)
            _spec((Fp, TN), lambda i, j: (0, j), buffers=wg_single),  # Wg_top
            _spec((Fp, TN), lambda i, j: (0, j), buffers=wg_single),  # Wg_bot
            _spec((1, TN), lambda i, j: (0, j)),                   # b2
            _spec((1, TN), lambda i, j: (0, j)),                   # b1 - b2
            _spec((1, TN), lambda i, j: (0, j)),                   # folded gate bias
        ],
        out_specs=pl.BlockSpec((TB, TN), lambda i, j: (i, j)),
        scratch_shapes=[pltpu.VMEM((TB, Fp), jnp.float32),
                        pltpu.VMEM((TB, Fp), jnp.float32)],
    )

    out = pl.pallas_call(
        gated_fusion_kernel,
        out_shape=jax.ShapeDtypeStruct((Bp, Fp), out_dtype),
        grid_spec=grid_spec,
        compiler_params=pltpu.CompilerParams(
            dimension_semantics=("parallel", "arbitrary"),
            vmem_limit_bytes=vmem_limit),
        cost_estimate=cost,
    )(x1, x2, w1, w2, wg1, wg2, b2, bd, bgp)

    return out[:B, :F]


def init_params(key, dim1, dim2, fused_dim):
    """Deterministic init; weights kept as [in, out] (PyTorch Linear W.T)."""
    ks = jax.random.split(key, 6)
    scale = 0.05
    w1 = scale * jax.random.normal(ks[0], (dim1, fused_dim), jnp.float32)
    b1 = scale * jax.random.normal(ks[1], (1, fused_dim), jnp.float32)
    w2 = scale * jax.random.normal(ks[2], (dim2, fused_dim), jnp.float32)
    b2 = scale * jax.random.normal(ks[3], (1, fused_dim), jnp.float32)
    # gate Linear has in_features = 2*fused_dim; split into the part that
    # multiplies x1_ and the part that multiplies x2_ (concat order: [x1_, x2_])
    wg = scale * jax.random.normal(ks[4], (2 * fused_dim, fused_dim), jnp.float32)
    wg1, wg2 = wg[:fused_dim], wg[fused_dim:]
    bg = scale * jax.random.normal(ks[5], (1, fused_dim), jnp.float32)
    return (w1, b1, w2, b2, wg1, wg2, bg)


def gated_fusion_ref(x1, x2, params):
    """Pure-JAX f32 reference mirroring the PyTorch forward exactly."""
    w1, b1, w2, b2, wg1, wg2, bg = params
    x1p = x1 @ w1 + b1
    x2p = x2 @ w2 + b2
    wg = jnp.concatenate([wg1, wg2], axis=0)
    gate_in = jnp.concatenate([x1p, x2p], axis=1)
    g = jax.nn.sigmoid(gate_in @ wg + bg)
    return g * x1p + (1.0 - g) * x2p


if __name__ == "__main__":
    # Small shapes consistent with the module: x1 [B, dim1], x2 [B, dim2]
    B, dim1, dim2, fused_dim = 8, 32, 48, 64

    key = jax.random.PRNGKey(0)
    k1, k2, kp = jax.random.split(key, 3)
    x1 = jax.random.normal(k1, (B, dim1), jnp.float32)
    x2 = jax.random.normal(k2, (B, dim2), jnp.float32)
    params = init_params(kp, dim1, dim2, fused_dim)

    out = jax.jit(gated_fusion)(x1, x2, params)
    out = jax.block_until_ready(out)

    ref = gated_fusion_ref(x1, x2, params)
    assert out.shape == (B, fused_dim)
    # bf16 MXU operands vs pure-f32 reference -> tolerance loosened accordingly.
    assert jnp.allclose(out, ref, atol=3e-2, rtol=3e-2), "mismatch vs reference"

    print("KERNEL_OK")
</pallas_src>

<mosaic_0001>
module attributes {stable_mosaic.version = 11 : i64} {
  func.func @gated_fusion_kernel(%arg0: i32, %arg1: i32, %arg2: memref<8x32xf32, #tpu.memory_space<vmem>>, %arg3: memref<8x48xf32, #tpu.memory_space<vmem>>, %arg4: memref<32x128xbf16, #tpu.memory_space<vmem>>, %arg5: memref<48x128xbf16, #tpu.memory_space<vmem>>, %arg6: memref<128x128xbf16, #tpu.memory_space<vmem>>, %arg7: memref<128x128xbf16, #tpu.memory_space<vmem>>, %arg8: memref<1x128xf32, #tpu.memory_space<vmem>>, %arg9: memref<1x128xf32, #tpu.memory_space<vmem>>, %arg10: memref<1x128xf32, #tpu.memory_space<vmem>>, %arg11: memref<8x128xf32, #tpu.memory_space<vmem>>, %arg12: memref<8x128xf32, #tpu.memory_space<vmem>>, %arg13: memref<8x128xf32, #tpu.memory_space<vmem>>) attributes {dimension_semantics = [#tpu.dimension_semantics<parallel>, #tpu.dimension_semantics<arbitrary>], iteration_bounds = array<i64: 1, 1>, scalar_prefetch = 0 : i64, scratch_operands = 2 : i64, tpu.core_type = #tpu.core_type<tc>, window_params = [{transform_indices = @transform_0, window_bounds = array<i64: 8, 32>}, {transform_indices = @transform_1, window_bounds = array<i64: 8, 48>}, {pipeline_mode = #tpu.pipeline_mode<synchronous>, transform_indices = @transform_2, window_bounds = array<i64: 32, 128>}, {pipeline_mode = #tpu.pipeline_mode<synchronous>, transform_indices = @transform_3, window_bounds = array<i64: 48, 128>}, {pipeline_mode = #tpu.pipeline_mode<synchronous>, transform_indices = @transform_4, window_bounds = array<i64: 128, 128>}, {pipeline_mode = #tpu.pipeline_mode<synchronous>, transform_indices = @transform_5, window_bounds = array<i64: 128, 128>}, {transform_indices = @transform_6, window_bounds = array<i64: 1, 128>}, {transform_indices = @transform_7, window_bounds = array<i64: 1, 128>}, {transform_indices = @transform_8, window_bounds = array<i64: 1, 128>}, {transform_indices = @transform_9, window_bounds = array<i64: 8, 128>}]} {
    %c0_i32 = arith.constant 0 : i32
    %0 = arith.cmpi eq, %arg1, %c0_i32 : i32
    %1 = arith.extui %0 : i1 to i32
    %c0_i32_0 = arith.constant 0 : i32
    %2 = arith.cmpi ne, %1, %c0_i32_0 : i32
    scf.if %2 {
      %c0_20 = arith.constant 0 : index
      %c0_21 = arith.constant 0 : index
      %36 = vector.load %arg2[%c0_20, %c0_21] : memref<8x32xf32, #tpu.memory_space<vmem>>, vector<8x32xf32>
      %37 = arith.truncf %36 : vector<8x32xf32> to vector<8x32xbf16>
      %c0_22 = arith.constant 0 : index
      %c0_23 = arith.constant 0 : index
      %38 = vector.load %arg4[%c0_22, %c0_23] : memref<32x128xbf16, #tpu.memory_space<vmem>>, vector<32x128xbf16>
      %cst_24 = arith.constant dense<0.000000e+00> : vector<8x128xf32>
      %39 = tpu.matmul %37, %38, %cst_24 {dimension_numbers = #tpu.dot_dimension_numbers<[1], [0], [0], [1], [0, 0, 1, 1], [], []>} : vector<8x32xbf16>, vector<32x128xbf16>, vector<8x128xf32> -> vector<8x128xf32>
      %c0_25 = arith.constant 0 : index
      %c0_26 = arith.constant 0 : index
      %40 = vector.load %arg12[%c0_25, %c0_26] : memref<8x128xf32, #tpu.memory_space<vmem>>, vector<8x128xf32>
      tpu.vector_store %arg12[%c0_25, %c0_26], %39 {strides = array<i32>} : memref<8x128xf32, #tpu.memory_space<vmem>>, vector<8x128xf32>,
      %c0_27 = arith.constant 0 : index
      %c0_28 = arith.constant 0 : index
      %41 = vector.load %arg3[%c0_27, %c0_28] : memref<8x48xf32, #tpu.memory_space<vmem>>, vector<8x48xf32>
      %42 = arith.truncf %41 : vector<8x48xf32> to vector<8x48xbf16>
      %c0_29 = arith.constant 0 : index
      %c0_30 = arith.constant 0 : index
      %43 = vector.load %arg5[%c0_29, %c0_30] : memref<48x128xbf16, #tpu.memory_space<vmem>>, vector<48x128xbf16>
      %cst_31 = arith.constant dense<0.000000e+00> : vector<8x128xf32>
      %44 = tpu.matmul %42, %43, %cst_31 {dimension_numbers = #tpu.dot_dimension_numbers<[1], [0], [0], [1], [0, 0, 1, 1], [], []>} : vector<8x48xbf16>, vector<48x128xbf16>, vector<8x128xf32> -> vector<8x128xf32>
      %c0_32 = arith.constant 0 : index
      %c0_33 = arith.constant 0 : index
      %45 = vector.load %arg13[%c0_32, %c0_33] : memref<8x128xf32, #tpu.memory_space<vmem>>, vector<8x128xf32>
      tpu.vector_store %arg13[%c0_32, %c0_33], %44 {strides = array<i32>} : memref<8x128xf32, #tpu.memory_space<vmem>>, vector<8x128xf32>,
    } else {
    }
    %c0 = arith.constant 0 : index
    %c0_1 = arith.constant 0 : index
    %3 = vector.load %arg12[%c0, %c0_1] : memref<8x128xf32, #tpu.memory_space<vmem>>, vector<8x128xf32>
    %c0_2 = arith.constant 0 : index
    %c0_3 = arith.constant 0 : index
    %4 = vector.load %arg13[%c0_2, %c0_3] : memref<8x128xf32, #tpu.memory_space<vmem>>, vector<8x128xf32>
    %5 = arith.truncf %3 : vector<8x128xf32> to vector<8x128xbf16>
    %c0_4 = arith.constant 0 : index
    %c0_5 = arith.constant 0 : index
    %6 = vector.load %arg6[%c0_4, %c0_5] : memref<128x128xbf16, #tpu.memory_space<vmem>>, vector<128x128xbf16>
    %cst = arith.constant dense<0.000000e+00> : vector<8x128xf32>
    %7 = tpu.matmul %5, %6, %cst {dimension_numbers = #tpu.dot_dimension_numbers<[1], [0], [0], [1], [0, 0, 1, 1], [], []>} : vector<8x128xbf16>, vector<128x128xbf16>, vector<8x128xf32> -> vector<8x128xf32>
    %8 = arith.truncf %4 : vector<8x128xf32> to vector<8x128xbf16>
    %c0_6 = arith.constant 0 : index
    %c0_7 = arith.constant 0 : index
    %9 = vector.load %arg7[%c0_6, %c0_7] : memref<128x128xbf16, #tpu.memory_space<vmem>>, vector<128x128xbf16>
    %cst_8 = arith.constant dense<0.000000e+00> : vector<8x128xf32>
    %10 = tpu.matmul %8, %9, %cst_8 {dimension_numbers = #tpu.dot_dimension_numbers<[1], [0], [0], [1], [0, 0, 1, 1], [], []>} : vector<8x128xbf16>, vector<128x128xbf16>, vector<8x128xf32> -> vector<8x128xf32>
    %11 = arith.addf %7, %10 : vector<8x128xf32>
    %c0_9 = arith.constant 0 : index
    %c0_10 = arith.constant 0 : index
    %12 = vector.load %arg10[%c0_9, %c0_10] : memref<1x128xf32, #tpu.memory_space<vmem>>, vector<1x128xf32>
    %13 = vector.broadcast %12 : vector<1x128xf32> to vector<8x128xf32>
    %14 = arith.addf %11, %13 : vector<8x128xf32>
    %15 = arith.negf %14 : vector<8x128xf32>
    %16 = math.exp %15 : vector<8x128xf32>
    %cst_11 = arith.constant 1.000000e+00 : f32
    %17 = vector.broadcast %cst_11 : f32 to vector<8x128xf32>
    %18 = arith.addf %17, %16 : vector<8x128xf32>
    %19 = arith.divf %17, %18 : vector<8x128xf32>
    %c128_i32 = arith.constant 128 : i32
    %20 = arith.muli %arg1, %c128_i32 : i32
    %21 = tpu.assume_multiple %20, 128 : i32
    %c0_12 = arith.constant 0 : index
    %22 = arith.index_cast %21 : i32 to index
    %23 = vector.load %arg12[%c0_12, %22] : memref<8x128xf32, #tpu.memory_space<vmem>>, vector<8x128xf32>
    %c0_13 = arith.constant 0 : index
    %24 = arith.index_cast %21 : i32 to index
    %25 = vector.load %arg13[%c0_13, %24] : memref<8x128xf32, #tpu.memory_space<vmem>>, vector<8x128xf32>
    %c0_14 = arith.constant 0 : index
    %c0_15 = arith.constant 0 : index
    %26 = vector.load %arg8[%c0_14, %c0_15] : memref<1x128xf32, #tpu.memory_space<vmem>>, vector<1x128xf32>
    %27 = vector.broadcast %26 : vector<1x128xf32> to vector<8x128xf32>
    %28 = arith.addf %25, %27 : vector<8x128xf32>
    %29 = arith.subf %23, %25 : vector<8x128xf32>
    %c0_16 = arith.constant 0 : index
    %c0_17 = arith.constant 0 : index
    %30 = vector.load %arg9[%c0_16, %c0_17] : memref<1x128xf32, #tpu.memory_space<vmem>>, vector<1x128xf32>
    %31 = vector.broadcast %30 : vector<1x128xf32> to vector<8x128xf32>
    %32 = arith.addf %29, %31 : vector<8x128xf32>
    %33 = arith.mulf %19, %32 : vector<8x128xf32>
    %34 = arith.addf %28, %33 : vector<8x128xf32>
    %c0_18 = arith.constant 0 : index
    %c0_19 = arith.constant 0 : index
    %35 = vector.load %arg11[%c0_18, %c0_19] : memref<8x128xf32, #tpu.memory_space<vmem>>, vector<8x128xf32>
    tpu.vector_store %arg11[%c0_18, %c0_19], %34 {strides = array<i32>} : memref<8x128xf32, #tpu.memory_space<vmem>>, vector<8x128xf32>,
    return
  }
  func.func @transform_0(%arg0: i32, %arg1: i32) -> (i32, i32) {
    %c0_i32 = arith.constant 0 : i32
    %c0_i32_0 = arith.constant 0 : i32
    return %arg0, %c0_i32 : i32, i32
  }
  func.func @transform_1(%arg0: i32, %arg1: i32) -> (i32, i32) {
    %c0_i32 = arith.constant 0 : i32
    %c0_i32_0 = arith.constant 0 : i32
    return %arg0, %c0_i32 : i32, i32
  }
  func.func @transform_2(%arg0: i32, %arg1: i32) -> (i32, i32) {
    %c0_i32 = arith.constant 0 : i32
    %c0_i32_0 = arith.constant 0 : i32
    %c0_i32_1 = arith.constant 0 : i32
    return %c0_i32, %c0_i32_0 : i32, i32
  }
  func.func @transform_3(%arg0: i32, %arg1: i32) -> (i32, i32) {
    %c0_i32 = arith.constant 0 : i32
    %c0_i32_0 = arith.constant 0 : i32
    %c0_i32_1 = arith.constant 0 : i32
    return %c0_i32, %c0_i32_0 : i32, i32
  }
  func.func @transform_4(%arg0: i32, %arg1: i32) -> (i32, i32) {
    %c0_i32 = arith.constant 0 : i32
    %c0_i32_0 = arith.constant 0 : i32
    return %c0_i32, %arg1 : i32, i32
  }
  func.func @transform_5(%arg0: i32, %arg1: i32) -> (i32, i32) {
    %c0_i32 = arith.constant 0 : i32
    %c0_i32_0 = arith.constant 0 : i32
    return %c0_i32, %arg1 : i32, i32
  }
  func.func @transform_6(%arg0: i32, %arg1: i32) -> (i32, i32) {
    %c0_i32 = arith.constant 0 : i32
    %c0_i32_0 = arith.constant 0 : i32
    return %c0_i32, %arg1 : i32, i32
  }
  func.func @transform_7(%arg0: i32, %arg1: i32) -> (i32, i32) {
    %c0_i32 = arith.constant 0 : i32
    %c0_i32_0 = arith.constant 0 : i32
    return %c0_i32, %arg1 : i32, i32
  }
  func.func @transform_8(%arg0: i32, %arg1: i32) -> (i32, i32) {
    %c0_i32 = arith.constant 0 : i32
    %c0_i32_0 = arith.constant 0 : i32
    return %c0_i32, %arg1 : i32, i32
  }
  func.func @transform_9(%arg0: i32, %arg1: i32) -> (i32, i32) {
    %c0_i32 = arith.constant 0 : i32
    return %arg0, %arg1 : i32, i32
  }
}

</mosaic_0001>

<bundles_post_ra>
// kernel: sub.1
= control target key start
LH: loop header
LB: loop body
LE: loop exit
PB: predicated region body
PF: predicated region fallthrough
CT: control target
= control target key end

     0   :  { %s34_s0 = inlined_call_operand.vmem [shape: f32[1,64], index: 0, kind: input, shape index: {}]   ;;  %s35_s1 = inlined_call_operand.vmem [shape: f32[1,64], index: 1, kind: input, shape index: {}]   ;;  %s36_s2 = inlined_call_operand.vmem [shape: f32[1,64], index: 2, kind: output, shape index: {}]  }
   0x1   :  { %v3_v0 = vld [vmem:[%s34_s0] sm:$0x1] }
   0x2   :  { %v4_v1 = vld [vmem:[%s35_s1] sm:$0x1] }
   0x3   :  { %v7_v2 = vsub.f32 %v3_v0, %v4_v1 }
   0x5   :  { %9 = vst [vmem:[%s36_s2] sm:$0x1] %v7_v2 }

</bundles_post_ra>
